<compile_context>
chip_gen: v7x
topology: tpu7x:2x2x1
jax: 0.10.0
libtpu: 0.0.40
codegen_flags: <defaults>
</compile_context>

<pallas_src>
import functools
import math

import jax
import jax.numpy as jnp
import numpy as np
from jax.experimental import pallas as pl
from jax.experimental.pallas import tpu as pltpu

LANES = 128
SUBLANES = 8
N_STAGES = 6


def _loss_kernel(*refs, inv_n_paf, inv_n_heat):
    """One grid step = one row tile; all 6 stages unrolled inside the body.

    refs layout:
      [0:6]   paf prediction tiles   (rp_t, 128)
      [6:12]  heat prediction tiles  (rh_t, 128)
      [12]    paf target tile        (rp_t, 128)
      [13]    heat target tile       (rh_t, 128)
      [14]    paf mask tile          (rp_t, 128)
      [15]    heat mask tile         (rh_t, 128)
      [16]    output partial sums    (1, 8, 128)
    """
    paf_pred_refs = refs[0:6]
    heat_pred_refs = refs[6:12]
    paf_gt_ref, heat_gt_ref = refs[12], refs[13]
    paf_mask_ref, heat_mask_ref = refs[14], refs[15]
    out_ref = refs[16]

    f32 = jnp.float32
    # Targets / masks are loaded once per tile and reused across all 6 stages.
    paf_gt = paf_gt_ref[...].astype(f32)
    heat_gt = heat_gt_ref[...].astype(f32)
    paf_mask = paf_mask_ref[...].astype(f32)
    heat_mask = heat_mask_ref[...].astype(f32)

    rp_t = paf_gt.shape[0]
    rh_t = heat_gt.shape[0]

    # Accumulate per-(sublane, lane) partial sums: pure VPU adds, no XLU.
    acc = jnp.zeros((SUBLANES, LANES), f32)
    for s in range(N_STAGES):
        d1 = (paf_pred_refs[s][...].astype(f32) - paf_gt) * paf_mask
        acc = acc + jnp.sum((d1 * d1).reshape(rp_t // SUBLANES, SUBLANES, LANES),
                            axis=0) * inv_n_paf
        d2 = (heat_pred_refs[s][...].astype(f32) - heat_gt) * heat_mask
        acc = acc + jnp.sum((d2 * d2).reshape(rh_t // SUBLANES, SUBLANES, LANES),
                            axis=0) * inv_n_heat

    out_ref[...] = acc.reshape(1, SUBLANES, LANES)


def _choose_num_tiles(rp, rh, paf_itemsize, heat_itemsize,
                      vmem_budget=10 * 1024 * 1024, target_paf_rows=2048):
    """Pick the number of row tiles G (grid size).

    Constraints: G divides rp and rh, tile rows are multiples of 8 (vreg
    sublanes), and the double-buffered VMEM footprint of all 16 input tiles
    fits the budget (safe under v5e's 16 MiB scoped default)."""
    def ok(g):
        return (rp % g == 0 and rh % g == 0
                and (rp // g) % SUBLANES == 0 and (rh // g) % SUBLANES == 0)

    def vmem(g):
        # 8 paf-shaped arrays (6 preds + gt + mask), 8 heat-shaped, x2 buffers.
        return 2 * LANES * (8 * (rp // g) * paf_itemsize
                            + 8 * (rh // g) * heat_itemsize)

    candidates = [g for g in range(1, rh + 1) if ok(g)]
    good = [g for g in candidates
            if vmem(g) <= vmem_budget and (rp // g) <= target_paf_rows]
    if good:
        return min(good)               # fewest grid steps that still fit
    fits = [g for g in candidates if vmem(g) <= vmem_budget]
    if fits:
        return min(fits)
    return max(candidates)             # best effort (smallest tiles)


def openpose_loss(saved_for_loss, heatmap_target, heat_mask, paf_target, paf_mask):
    """saved_for_loss: list of 12 NCHW arrays (even = PAF preds, odd = heatmap preds)."""
    n_paf = int(np.prod(paf_target.shape))
    n_heat = int(np.prod(heatmap_target.shape))
    assert n_paf % (SUBLANES * LANES) == 0 and n_heat % (SUBLANES * LANES) == 0, (
        "total element counts must be multiples of 1024 (8 sublanes x 128 lanes)")
    rp = n_paf // LANES
    rh = n_heat // LANES

    # Lane-dense 2-D views; NO dtype cast here (cast happens inside the kernel).
    paf_preds = [saved_for_loss[2 * i].reshape(rp, LANES) for i in range(N_STAGES)]
    heat_preds = [saved_for_loss[2 * i + 1].reshape(rh, LANES) for i in range(N_STAGES)]
    paf_gt2 = paf_target.reshape(rp, LANES)
    heat_gt2 = heatmap_target.reshape(rh, LANES)
    paf_mask2 = paf_mask.reshape(rp, LANES)
    heat_mask2 = heat_mask.reshape(rh, LANES)

    paf_itemsize = jnp.dtype(paf_preds[0].dtype).itemsize
    heat_itemsize = jnp.dtype(heat_preds[0].dtype).itemsize
    g_tiles = _choose_num_tiles(rp, rh, paf_itemsize, heat_itemsize)
    rp_t = rp // g_tiles
    rh_t = rh // g_tiles

    kernel = functools.partial(_loss_kernel,
                               inv_n_paf=1.0 / n_paf,
                               inv_n_heat=1.0 / n_heat)

    paf_spec = pl.BlockSpec((rp_t, LANES), lambda t: (t, 0))
    heat_spec = pl.BlockSpec((rh_t, LANES), lambda t: (t, 0))

    inputs = tuple(paf_preds) + tuple(heat_preds) + (paf_gt2, heat_gt2,
                                                     paf_mask2, heat_mask2)
    in_specs = ([paf_spec] * N_STAGES + [heat_spec] * N_STAGES
                + [paf_spec, heat_spec, paf_spec, heat_spec])

    bytes_in = sum(int(np.prod(x.shape)) * jnp.dtype(x.dtype).itemsize
                   for x in inputs)
    cost = pl.CostEstimate(
        flops=4 * N_STAGES * (n_paf + n_heat),
        transcendentals=0,
        bytes_accessed=bytes_in + g_tiles * SUBLANES * LANES * 4,
    )

    partials = pl.pallas_call(
        kernel,
        out_shape=jax.ShapeDtypeStruct((g_tiles, SUBLANES, LANES), jnp.float32),
        grid_spec=pltpu.PrefetchScalarGridSpec(
            num_scalar_prefetch=0,
            grid=(g_tiles,),
            in_specs=in_specs,
            out_specs=pl.BlockSpec((1, SUBLANES, LANES), lambda t: (t, 0, 0)),
        ),
        compiler_params=pltpu.CompilerParams(
            dimension_semantics=("parallel",)),   # independent row tiles -> megacore
        cost_estimate=cost,
    )(*inputs)

    # Tiny cross-lane reduction of the per-tile partials outside the kernel.
    return jnp.sum(partials)


def _reference_loss(saved_for_loss, heatmap_target, heat_mask, paf_target, paf_mask):
    loss = 0.0
    for i in range(N_STAGES):
        pred1 = saved_for_loss[2 * i].astype(jnp.float32) * paf_mask
        gt1 = paf_target.astype(jnp.float32) * paf_mask
        pred2 = saved_for_loss[2 * i + 1].astype(jnp.float32) * heat_mask
        gt2 = heatmap_target.astype(jnp.float32) * heat_mask
        loss += jnp.mean((pred1 - gt1) ** 2) + jnp.mean((pred2 - gt2) ** 2)
    return loss


if __name__ == "__main__":
    # Small OpenPose-like shapes: B=2, C_paf=8, C_heat=4, H=W=16 (NCHW).
    B, C_PAF, C_HEAT, H, W = 2, 8, 4, 16, 16
    key = jax.random.PRNGKey(0)
    keys = jax.random.split(key, 16)

    saved_for_loss = []
    for i in range(N_STAGES):
        saved_for_loss.append(
            jax.random.normal(keys[2 * i], (B, C_PAF, H, W), dtype=jnp.float32))
        saved_for_loss.append(
            jax.random.normal(keys[2 * i + 1], (B, C_HEAT, H, W), dtype=jnp.float32))

    heatmap_target = jax.random.normal(keys[12], (B, C_HEAT, H, W), dtype=jnp.float32)
    paf_target = jax.random.normal(keys[13], (B, C_PAF, H, W), dtype=jnp.float32)
    heat_mask = (jax.random.uniform(keys[14], (B, C_HEAT, H, W)) > 0.3).astype(jnp.float32)
    paf_mask = (jax.random.uniform(keys[15], (B, C_PAF, H, W)) > 0.3).astype(jnp.float32)

    loss = openpose_loss(saved_for_loss, heatmap_target, heat_mask, paf_target, paf_mask)
    loss = jax.block_until_ready(loss)

    ref = jax.block_until_ready(
        _reference_loss(saved_for_loss, heatmap_target, heat_mask, paf_target, paf_mask))
    np.testing.assert_allclose(np.asarray(loss), np.asarray(ref), rtol=1e-5, atol=1e-5)

    print("KERNEL_OK")
</pallas_src>

<mosaic_0001>
module attributes {stable_mosaic.version = 11 : i64} {
  func.func @_loss_kernel(%arg0: i32, %arg1: memref<32x128xf32, #tpu.memory_space<vmem>>, %arg2: memref<32x128xf32, #tpu.memory_space<vmem>>, %arg3: memref<32x128xf32, #tpu.memory_space<vmem>>, %arg4: memref<32x128xf32, #tpu.memory_space<vmem>>, %arg5: memref<32x128xf32, #tpu.memory_space<vmem>>, %arg6: memref<32x128xf32, #tpu.memory_space<vmem>>, %arg7: memref<16x128xf32, #tpu.memory_space<vmem>>, %arg8: memref<16x128xf32, #tpu.memory_space<vmem>>, %arg9: memref<16x128xf32, #tpu.memory_space<vmem>>, %arg10: memref<16x128xf32, #tpu.memory_space<vmem>>, %arg11: memref<16x128xf32, #tpu.memory_space<vmem>>, %arg12: memref<16x128xf32, #tpu.memory_space<vmem>>, %arg13: memref<32x128xf32, #tpu.memory_space<vmem>>, %arg14: memref<16x128xf32, #tpu.memory_space<vmem>>, %arg15: memref<32x128xf32, #tpu.memory_space<vmem>>, %arg16: memref<16x128xf32, #tpu.memory_space<vmem>>, %arg17: memref<1x8x128xf32, #tpu.memory_space<vmem>>) attributes {dimension_semantics = [#tpu.dimension_semantics<parallel>], iteration_bounds = array<i64: 1>, scalar_prefetch = 0 : i64, scratch_operands = 0 : i64, tpu.core_type = #tpu.core_type<tc>, window_params = [{transform_indices = @transform_0, window_bounds = array<i64: 32, 128>}, {transform_indices = @transform_1, window_bounds = array<i64: 32, 128>}, {transform_indices = @transform_2, window_bounds = array<i64: 32, 128>}, {transform_indices = @transform_3, window_bounds = array<i64: 32, 128>}, {transform_indices = @transform_4, window_bounds = array<i64: 32, 128>}, {transform_indices = @transform_5, window_bounds = array<i64: 32, 128>}, {transform_indices = @transform_6, window_bounds = array<i64: 16, 128>}, {transform_indices = @transform_7, window_bounds = array<i64: 16, 128>}, {transform_indices = @transform_8, window_bounds = array<i64: 16, 128>}, {transform_indices = @transform_9, window_bounds = array<i64: 16, 128>}, {transform_indices = @transform_10, window_bounds = array<i64: 16, 128>}, {transform_indices = @transform_11, window_bounds = array<i64: 16, 128>}, {transform_indices = @transform_12, window_bounds = array<i64: 32, 128>}, {transform_indices = @transform_13, window_bounds = array<i64: 16, 128>}, {transform_indices = @transform_14, window_bounds = array<i64: 32, 128>}, {transform_indices = @transform_15, window_bounds = array<i64: 16, 128>}, {transform_indices = @transform_16, window_bounds = array<i64: 1, 8, 128>}]} {
    %c0 = arith.constant 0 : index
    %c0_0 = arith.constant 0 : index
    %0 = vector.load %arg13[%c0, %c0_0] : memref<32x128xf32, #tpu.memory_space<vmem>>, vector<32x128xf32>
    %c0_1 = arith.constant 0 : index
    %c0_2 = arith.constant 0 : index
    %1 = vector.load %arg14[%c0_1, %c0_2] : memref<16x128xf32, #tpu.memory_space<vmem>>, vector<16x128xf32>
    %c0_3 = arith.constant 0 : index
    %c0_4 = arith.constant 0 : index
    %2 = vector.load %arg15[%c0_3, %c0_4] : memref<32x128xf32, #tpu.memory_space<vmem>>, vector<32x128xf32>
    %c0_5 = arith.constant 0 : index
    %c0_6 = arith.constant 0 : index
    %3 = vector.load %arg16[%c0_5, %c0_6] : memref<16x128xf32, #tpu.memory_space<vmem>>, vector<16x128xf32>
    %cst = arith.constant 0.000000e+00 : f32
    %4 = vector.broadcast %cst : f32 to vector<8x128xf32>
    %c0_7 = arith.constant 0 : index
    %c0_8 = arith.constant 0 : index
    %5 = vector.load %arg1[%c0_7, %c0_8] : memref<32x128xf32, #tpu.memory_space<vmem>>, vector<32x128xf32>
    %6 = arith.subf %5, %0 : vector<32x128xf32>
    %7 = arith.mulf %6, %2 : vector<32x128xf32>
    %8 = arith.mulf %7, %7 : vector<32x128xf32>
    %9 = vector.shape_cast %8 : vector<32x128xf32> to vector<4x8x128xf32>
    %cst_9 = arith.constant dense<0.000000e+00> : vector<8x128xf32>
    %10 = vector.multi_reduction <add>, %9, %cst_9 [0] : vector<4x8x128xf32> to vector<8x128xf32>
    %cst_10 = arith.constant 2.44140625E-4 : f32
    %11 = vector.broadcast %cst_10 : f32 to vector<8x128xf32>
    %12 = arith.mulf %10, %11 : vector<8x128xf32>
    %13 = arith.addf %4, %12 : vector<8x128xf32>
    %c0_11 = arith.constant 0 : index
    %c0_12 = arith.constant 0 : index
    %14 = vector.load %arg7[%c0_11, %c0_12] : memref<16x128xf32, #tpu.memory_space<vmem>>, vector<16x128xf32>
    %15 = arith.subf %14, %1 : vector<16x128xf32>
    %16 = arith.mulf %15, %3 : vector<16x128xf32>
    %17 = arith.mulf %16, %16 : vector<16x128xf32>
    %18 = vector.shape_cast %17 : vector<16x128xf32> to vector<2x8x128xf32>
    %cst_13 = arith.constant dense<0.000000e+00> : vector<8x128xf32>
    %19 = vector.multi_reduction <add>, %18, %cst_13 [0] : vector<2x8x128xf32> to vector<8x128xf32>
    %cst_14 = arith.constant 4.8828125E-4 : f32
    %20 = vector.broadcast %cst_14 : f32 to vector<8x128xf32>
    %21 = arith.mulf %19, %20 : vector<8x128xf32>
    %22 = arith.addf %13, %21 : vector<8x128xf32>
    %c0_15 = arith.constant 0 : index
    %c0_16 = arith.constant 0 : index
    %23 = vector.load %arg2[%c0_15, %c0_16] : memref<32x128xf32, #tpu.memory_space<vmem>>, vector<32x128xf32>
    %24 = arith.subf %23, %0 : vector<32x128xf32>
    %25 = arith.mulf %24, %2 : vector<32x128xf32>
    %26 = arith.mulf %25, %25 : vector<32x128xf32>
    %27 = vector.shape_cast %26 : vector<32x128xf32> to vector<4x8x128xf32>
    %cst_17 = arith.constant dense<0.000000e+00> : vector<8x128xf32>
    %28 = vector.multi_reduction <add>, %27, %cst_17 [0] : vector<4x8x128xf32> to vector<8x128xf32>
    %cst_18 = arith.constant 2.44140625E-4 : f32
    %29 = vector.broadcast %cst_18 : f32 to vector<8x128xf32>
    %30 = arith.mulf %28, %29 : vector<8x128xf32>
    %31 = arith.addf %22, %30 : vector<8x128xf32>
    %c0_19 = arith.constant 0 : index
    %c0_20 = arith.constant 0 : index
    %32 = vector.load %arg8[%c0_19, %c0_20] : memref<16x128xf32, #tpu.memory_space<vmem>>, vector<16x128xf32>
    %33 = arith.subf %32, %1 : vector<16x128xf32>
    %34 = arith.mulf %33, %3 : vector<16x128xf32>
    %35 = arith.mulf %34, %34 : vector<16x128xf32>
    %36 = vector.shape_cast %35 : vector<16x128xf32> to vector<2x8x128xf32>
    %cst_21 = arith.constant dense<0.000000e+00> : vector<8x128xf32>
    %37 = vector.multi_reduction <add>, %36, %cst_21 [0] : vector<2x8x128xf32> to vector<8x128xf32>
    %cst_22 = arith.constant 4.8828125E-4 : f32
    %38 = vector.broadcast %cst_22 : f32 to vector<8x128xf32>
    %39 = arith.mulf %37, %38 : vector<8x128xf32>
    %40 = arith.addf %31, %39 : vector<8x128xf32>
    %c0_23 = arith.constant 0 : index
    %c0_24 = arith.constant 0 : index
    %41 = vector.load %arg3[%c0_23, %c0_24] : memref<32x128xf32, #tpu.memory_space<vmem>>, vector<32x128xf32>
    %42 = arith.subf %41, %0 : vector<32x128xf32>
    %43 = arith.mulf %42, %2 : vector<32x128xf32>
    %44 = arith.mulf %43, %43 : vector<32x128xf32>
    %45 = vector.shape_cast %44 : vector<32x128xf32> to vector<4x8x128xf32>
    %cst_25 = arith.constant dense<0.000000e+00> : vector<8x128xf32>
    %46 = vector.multi_reduction <add>, %45, %cst_25 [0] : vector<4x8x128xf32> to vector<8x128xf32>
    %cst_26 = arith.constant 2.44140625E-4 : f32
    %47 = vector.broadcast %cst_26 : f32 to vector<8x128xf32>
    %48 = arith.mulf %46, %47 : vector<8x128xf32>
    %49 = arith.addf %40, %48 : vector<8x128xf32>
    %c0_27 = arith.constant 0 : index
    %c0_28 = arith.constant 0 : index
    %50 = vector.load %arg9[%c0_27, %c0_28] : memref<16x128xf32, #tpu.memory_space<vmem>>, vector<16x128xf32>
    %51 = arith.subf %50, %1 : vector<16x128xf32>
    %52 = arith.mulf %51, %3 : vector<16x128xf32>
    %53 = arith.mulf %52, %52 : vector<16x128xf32>
    %54 = vector.shape_cast %53 : vector<16x128xf32> to vector<2x8x128xf32>
    %cst_29 = arith.constant dense<0.000000e+00> : vector<8x128xf32>
    %55 = vector.multi_reduction <add>, %54, %cst_29 [0] : vector<2x8x128xf32> to vector<8x128xf32>
    %cst_30 = arith.constant 4.8828125E-4 : f32
    %56 = vector.broadcast %cst_30 : f32 to vector<8x128xf32>
    %57 = arith.mulf %55, %56 : vector<8x128xf32>
    %58 = arith.addf %49, %57 : vector<8x128xf32>
    %c0_31 = arith.constant 0 : index
    %c0_32 = arith.constant 0 : index
    %59 = vector.load %arg4[%c0_31, %c0_32] : memref<32x128xf32, #tpu.memory_space<vmem>>, vector<32x128xf32>
    %60 = arith.subf %59, %0 : vector<32x128xf32>
    %61 = arith.mulf %60, %2 : vector<32x128xf32>
    %62 = arith.mulf %61, %61 : vector<32x128xf32>
    %63 = vector.shape_cast %62 : vector<32x128xf32> to vector<4x8x128xf32>
    %cst_33 = arith.constant dense<0.000000e+00> : vector<8x128xf32>
    %64 = vector.multi_reduction <add>, %63, %cst_33 [0] : vector<4x8x128xf32> to vector<8x128xf32>
    %cst_34 = arith.constant 2.44140625E-4 : f32
    %65 = vector.broadcast %cst_34 : f32 to vector<8x128xf32>
    %66 = arith.mulf %64, %65 : vector<8x128xf32>
    %67 = arith.addf %58, %66 : vector<8x128xf32>
    %c0_35 = arith.constant 0 : index
    %c0_36 = arith.constant 0 : index
    %68 = vector.load %arg10[%c0_35, %c0_36] : memref<16x128xf32, #tpu.memory_space<vmem>>, vector<16x128xf32>
    %69 = arith.subf %68, %1 : vector<16x128xf32>
    %70 = arith.mulf %69, %3 : vector<16x128xf32>
    %71 = arith.mulf %70, %70 : vector<16x128xf32>
    %72 = vector.shape_cast %71 : vector<16x128xf32> to vector<2x8x128xf32>
    %cst_37 = arith.constant dense<0.000000e+00> : vector<8x128xf32>
    %73 = vector.multi_reduction <add>, %72, %cst_37 [0] : vector<2x8x128xf32> to vector<8x128xf32>
    %cst_38 = arith.constant 4.8828125E-4 : f32
    %74 = vector.broadcast %cst_38 : f32 to vector<8x128xf32>
    %75 = arith.mulf %73, %74 : vector<8x128xf32>
    %76 = arith.addf %67, %75 : vector<8x128xf32>
    %c0_39 = arith.constant 0 : index
    %c0_40 = arith.constant 0 : index
    %77 = vector.load %arg5[%c0_39, %c0_40] : memref<32x128xf32, #tpu.memory_space<vmem>>, vector<32x128xf32>
    %78 = arith.subf %77, %0 : vector<32x128xf32>
    %79 = arith.mulf %78, %2 : vector<32x128xf32>
    %80 = arith.mulf %79, %79 : vector<32x128xf32>
    %81 = vector.shape_cast %80 : vector<32x128xf32> to vector<4x8x128xf32>
    %cst_41 = arith.constant dense<0.000000e+00> : vector<8x128xf32>
    %82 = vector.multi_reduction <add>, %81, %cst_41 [0] : vector<4x8x128xf32> to vector<8x128xf32>
    %cst_42 = arith.constant 2.44140625E-4 : f32
    %83 = vector.broadcast %cst_42 : f32 to vector<8x128xf32>
    %84 = arith.mulf %82, %83 : vector<8x128xf32>
    %85 = arith.addf %76, %84 : vector<8x128xf32>
    %c0_43 = arith.constant 0 : index
    %c0_44 = arith.constant 0 : index
    %86 = vector.load %arg11[%c0_43, %c0_44] : memref<16x128xf32, #tpu.memory_space<vmem>>, vector<16x128xf32>
    %87 = arith.subf %86, %1 : vector<16x128xf32>
    %88 = arith.mulf %87, %3 : vector<16x128xf32>
    %89 = arith.mulf %88, %88 : vector<16x128xf32>
    %90 = vector.shape_cast %89 : vector<16x128xf32> to vector<2x8x128xf32>
    %cst_45 = arith.constant dense<0.000000e+00> : vector<8x128xf32>
    %91 = vector.multi_reduction <add>, %90, %cst_45 [0] : vector<2x8x128xf32> to vector<8x128xf32>
    %cst_46 = arith.constant 4.8828125E-4 : f32
    %92 = vector.broadcast %cst_46 : f32 to vector<8x128xf32>
    %93 = arith.mulf %91, %92 : vector<8x128xf32>
    %94 = arith.addf %85, %93 : vector<8x128xf32>
    %c0_47 = arith.constant 0 : index
    %c0_48 = arith.constant 0 : index
    %95 = vector.load %arg6[%c0_47, %c0_48] : memref<32x128xf32, #tpu.memory_space<vmem>>, vector<32x128xf32>
    %96 = arith.subf %95, %0 : vector<32x128xf32>
    %97 = arith.mulf %96, %2 : vector<32x128xf32>
    %98 = arith.mulf %97, %97 : vector<32x128xf32>
    %99 = vector.shape_cast %98 : vector<32x128xf32> to vector<4x8x128xf32>
    %cst_49 = arith.constant dense<0.000000e+00> : vector<8x128xf32>
    %100 = vector.multi_reduction <add>, %99, %cst_49 [0] : vector<4x8x128xf32> to vector<8x128xf32>
    %cst_50 = arith.constant 2.44140625E-4 : f32
    %101 = vector.broadcast %cst_50 : f32 to vector<8x128xf32>
    %102 = arith.mulf %100, %101 : vector<8x128xf32>
    %103 = arith.addf %94, %102 : vector<8x128xf32>
    %c0_51 = arith.constant 0 : index
    %c0_52 = arith.constant 0 : index
    %104 = vector.load %arg12[%c0_51, %c0_52] : memref<16x128xf32, #tpu.memory_space<vmem>>, vector<16x128xf32>
    %105 = arith.subf %104, %1 : vector<16x128xf32>
    %106 = arith.mulf %105, %3 : vector<16x128xf32>
    %107 = arith.mulf %106, %106 : vector<16x128xf32>
    %108 = vector.shape_cast %107 : vector<16x128xf32> to vector<2x8x128xf32>
    %cst_53 = arith.constant dense<0.000000e+00> : vector<8x128xf32>
    %109 = vector.multi_reduction <add>, %108, %cst_53 [0] : vector<2x8x128xf32> to vector<8x128xf32>
    %cst_54 = arith.constant 4.8828125E-4 : f32
    %110 = vector.broadcast %cst_54 : f32 to vector<8x128xf32>
    %111 = arith.mulf %109, %110 : vector<8x128xf32>
    %112 = arith.addf %103, %111 : vector<8x128xf32>
    %113 = vector.shape_cast %112 : vector<8x128xf32> to vector<1x8x128xf32>
    %c0_55 = arith.constant 0 : index
    %c0_56 = arith.constant 0 : index
    %c0_57 = arith.constant 0 : index
    %114 = vector.load %arg17[%c0_55, %c0_56, %c0_57] : memref<1x8x128xf32, #tpu.memory_space<vmem>>, vector<1x8x128xf32>
    tpu.vector_store %arg17[%c0_55, %c0_56, %c0_57], %113 {strides = array<i32>} : memref<1x8x128xf32, #tpu.memory_space<vmem>>, vector<1x8x128xf32>,
    return
  }
  func.func @transform_0(%arg0: i32) -> (i32, i32) {
    %c0_i32 = arith.constant 0 : i32
    %c0_i32_0 = arith.constant 0 : i32
    return %arg0, %c0_i32 : i32, i32
  }
  func.func @transform_1(%arg0: i32) -> (i32, i32) {
    %c0_i32 = arith.constant 0 : i32
    %c0_i32_0 = arith.constant 0 : i32
    return %arg0, %c0_i32 : i32, i32
  }
  func.func @transform_2(%arg0: i32) -> (i32, i32) {
    %c0_i32 = arith.constant 0 : i32
    %c0_i32_0 = arith.constant 0 : i32
    return %arg0, %c0_i32 : i32, i32
  }
  func.func @transform_3(%arg0: i32) -> (i32, i32) {
    %c0_i32 = arith.constant 0 : i32
    %c0_i32_0 = arith.constant 0 : i32
    return %arg0, %c0_i32 : i32, i32
  }
  func.func @transform_4(%arg0: i32) -> (i32, i32) {
    %c0_i32 = arith.constant 0 : i32
    %c0_i32_0 = arith.constant 0 : i32
    return %arg0, %c0_i32 : i32, i32
  }
  func.func @transform_5(%arg0: i32) -> (i32, i32) {
    %c0_i32 = arith.constant 0 : i32
    %c0_i32_0 = arith.constant 0 : i32
    return %arg0, %c0_i32 : i32, i32
  }
  func.func @transform_6(%arg0: i32) -> (i32, i32) {
    %c0_i32 = arith.constant 0 : i32
    %c0_i32_0 = arith.constant 0 : i32
    return %arg0, %c0_i32 : i32, i32
  }
  func.func @transform_7(%arg0: i32) -> (i32, i32) {
    %c0_i32 = arith.constant 0 : i32
    %c0_i32_0 = arith.constant 0 : i32
    return %arg0, %c0_i32 : i32, i32
  }
  func.func @transform_8(%arg0: i32) -> (i32, i32) {
    %c0_i32 = arith.constant 0 : i32
    %c0_i32_0 = arith.constant 0 : i32
    return %arg0, %c0_i32 : i32, i32
  }
  func.func @transform_9(%arg0: i32) -> (i32, i32) {
    %c0_i32 = arith.constant 0 : i32
    %c0_i32_0 = arith.constant 0 : i32
    return %arg0, %c0_i32 : i32, i32
  }
  func.func @transform_10(%arg0: i32) -> (i32, i32) {
    %c0_i32 = arith.constant 0 : i32
    %c0_i32_0 = arith.constant 0 : i32
    return %arg0, %c0_i32 : i32, i32
  }
  func.func @transform_11(%arg0: i32) -> (i32, i32) {
    %c0_i32 = arith.constant 0 : i32
    %c0_i32_0 = arith.constant 0 : i32
    return %arg0, %c0_i32 : i32, i32
  }
  func.func @transform_12(%arg0: i32) -> (i32, i32) {
    %c0_i32 = arith.constant 0 : i32
    %c0_i32_0 = arith.constant 0 : i32
    return %arg0, %c0_i32 : i32, i32
  }
  func.func @transform_13(%arg0: i32) -> (i32, i32) {
    %c0_i32 = arith.constant 0 : i32
    %c0_i32_0 = arith.constant 0 : i32
    return %arg0, %c0_i32 : i32, i32
  }
  func.func @transform_14(%arg0: i32) -> (i32, i32) {
    %c0_i32 = arith.constant 0 : i32
    %c0_i32_0 = arith.constant 0 : i32
    return %arg0, %c0_i32 : i32, i32
  }
  func.func @transform_15(%arg0: i32) -> (i32, i32) {
    %c0_i32 = arith.constant 0 : i32
    %c0_i32_0 = arith.constant 0 : i32
    return %arg0, %c0_i32 : i32, i32
  }
  func.func @transform_16(%arg0: i32) -> (i32, i32, i32) {
    %c0_i32 = arith.constant 0 : i32
    %c0_i32_0 = arith.constant 0 : i32
    %c0_i32_1 = arith.constant 0 : i32
    return %arg0, %c0_i32, %c0_i32_0 : i32, i32, i32
  }
}

</mosaic_0001>

<bundles_post_ra>
// kernel: tpu_custom_call.1
= control target key start
LH: loop header
LB: loop body
LE: loop exit
PB: predicated region body
PF: predicated region fallthrough
CT: control target
= control target key end

     0   :  { %s1323_s0 = inlined_call_operand.hbm [shape: f32[32,128], index: 0, kind: input, shape index: {}]   ;;  %s1324_s1 = inlined_call_operand.hbm [shape: f32[32,128], index: 1, kind: input, shape index: {}]   ;;  %s1325_s2 = inlined_call_operand.hbm [shape: f32[32,128], index: 2, kind: input, shape index: {}]   ;;  %s1326_s3 = inlined_call_operand.hbm [shape: f32[32,128], index: 3, kind: input, shape index: {}]   ;;  %s1327_s4 = inlined_call_operand.hbm [shape: f32[32,128], index: 4, kind: input, shape index: {}]   ;;  %s1328_s5 = inlined_call_operand.hbm [shape: f32[32,128], index: 5, kind: input, shape index: {}]   ;;  %s1329_s6 = inlined_call_operand.hbm [shape: f32[16,128], index: 6, kind: input, shape index: {}]   ;;  %s1330_s7 = inlined_call_operand.hbm [shape: f32[16,128], index: 7, kind: input, shape index: {}]   ;;  %s1331_s8 = inlined_call_operand.hbm [shape: f32[16,128], index: 8, kind: input, shape index: {}]   ;;  %s1332_s9 = inlined_call_operand.hbm [shape: f32[16,128], index: 9, kind: input, shape index: {}]   ;;  %s1333_s10 = inlined_call_operand.hbm [shape: f32[16,128], index: 10, kind: input, shape index: {}]   ;;  %s1334_s11 = inlined_call_operand.hbm [shape: f32[16,128], index: 11, kind: input, shape index: {}]   ;;  %s1335_s12 = inlined_call_operand.vmem [shape: f32[32,128], index: 12, kind: input, shape index: {}]   ;;  %s1336_s13 = inlined_call_operand.vmem [shape: f32[16,128], index: 13, kind: input, shape index: {}]   ;;  %s1337_s14 = inlined_call_operand.hbm [shape: f32[32,128], index: 14, kind: input, shape index: {}]   ;;  %s1338_s15 = inlined_call_operand.hbm [shape: f32[16,128], index: 15, kind: input, shape index: {}]   ;;  %s1339_s16 = inlined_call_operand.hbm [shape: f32[1,8,128], index: 16, kind: output, shape index: {}]  }
   0x1   :  { %1341 = sst [smem:[#allocation35_spill]] %s1323_s0 }
   0x2   :  { %21 = vsyncpa [#allocation3], 0 }
   0x3   :  { %22 = vsyncpa [#allocation6], 0 }
   0x4   :  { %23 = vsyncpa [#allocation9], 0 }
   0x5   :  { %24 = vsyncpa [#allocation12], 0 }
   0x6   :  { %25 = vsyncpa [#allocation15], 0 }
   0x7   :  { %26 = vsyncpa [#allocation18], 0 }
   0x8   :  { %27 = vsyncpa [#allocation21], 0 }
   0x9   :  { %28 = vsyncpa [#allocation24], 0 }
   0xa   :  { %29 = vsyncpa [#allocation4], 0  ;;  %s836_s21 = smov [#allocation5]   ;;  %s837_s23 = smov [#allocation8]  }
   0xb   :  { %s47_s22 = sshll.u32 %s836_s21, 4  ;;  %s71_s24 = sshll.u32 %s837_s23, 4  ;;  %s48_s22 = int_to_ptr.vmem [resolvable:$true] %s47_s22  ;;  %s938_s24 = int_to_ptr.vmem [resolvable:$true] %s71_s24 }
   0xc   :  { %s488_s27 = scalar_lea.hbm %s1324_s1, 512 }
   0xd   :  { %p489_p0 = scmp.ne.s32.totalorder %s1324_s1, %s488_s27  ;;  %p492_p1 = scmp.lt.u32.totalorder %s488_s27, %s1324_s1 }
   0xf   :  { %p494_p2 = pnand %p492_p1, %p489_p0 }
  0x11   :  { %497 = shalt.err (!%p494_p2)
}
  0x12   :  { %s498_s17 = scalar_lea.vmem %s48_s22, 512  ;;  %p503_p4 = scmp.lt.s32.totalorder %s48_s22, %s48_s22 }
  0x13   :  { %p499_p3 = scmp.ne.s32.totalorder %s48_s22, %s498_s17  ;;  %p504_p5 = scmp.lt.s32.totalorder %s498_s17, %s498_s17 }
  0x15   :  { %p505_p6 = por %p504_p5, %p503_p4 }
  0x17   :  { %p506_p7 = pnand %p505_p6, %p499_p3 }
  0x19   :  { %509 = shalt.err (!%p506_p7)
}
  0x1a   :  { %s838_s18 = smov 128   ;;  %s839_s19 = smov 8  }
  0x1b   :  { %53 = dma.hbm_to_vmem [thread:$0]  %s1324_s1, 512, %s48_s22, [#allocation6], %s838_s18, %s838_s18, %s839_s19  }
  0x1c   :  { %s510_s26 = scalar_lea.hbm %s1326_s3, 512 }
  0x1d   :  { %p511_p8 = scmp.ne.s32.totalorder %s1326_s3, %s510_s26  ;;  %p514_p9 = scmp.lt.u32.totalorder %s510_s26, %s1326_s3 }
  0x1f   :  { %p516_p10 = pnand %p514_p9, %p511_p8 }
  0x21   :  { %519 = shalt.err (!%p516_p10)
}
  0x22   :  { %s520_s0 = scalar_lea.vmem %s938_s24, 512  ;;  %p525_p12 = scmp.lt.s32.totalorder %s938_s24, %s938_s24 }
  0x23   :  { %p521_p11 = scmp.ne.s32.totalorder %s938_s24, %s520_s0  ;;  %p526_p13 = scmp.lt.s32.totalorder %s520_s0, %s520_s0 }
  0x25   :  { %p527_p0 = por %p526_p13, %p525_p12 }
  0x27   :  { %p528_p1 = pnand %p527_p0, %p521_p11 }
  0x29   :  { %531 = shalt.err (!%p528_p1)
}
  0x2a   :  { %77 = dma.hbm_to_vmem [thread:$0]  %s1326_s3, 512, %s938_s24, [#allocation9], %s838_s18, %s838_s18, %s839_s19  }
  0x2b   :  { %s840_s17 = smov [#allocation11]   ;;  %s841_s21 = smov [#allocation14]  }
  0x2c   :  { %s95_s20 = sshll.u32 %s840_s17, 4  ;;  %s119_s23 = sshll.u32 %s841_s21, 4  ;;  %s96_s20 = int_to_ptr.vmem [resolvable:$true] %s95_s20  ;;  %s975_s23 = int_to_ptr.vmem [resolvable:$true] %s119_s23 }
  0x2d   :  { %s532_s27 = scalar_lea.hbm %s1328_s5, 512 }
  0x2e   :  { %p533_p2 = scmp.ne.s32.totalorder %s1328_s5, %s532_s27  ;;  %p536_p3 = scmp.lt.u32.totalorder %s532_s27, %s1328_s5 }
  0x30   :  { %p538_p4 = pnand %p536_p3, %p533_p2 }
  0x32   :  { %541 = shalt.err (!%p538_p4)
}
  0x33   :  { %s542_s3 = scalar_lea.vmem %s96_s20, 512  ;;  %p547_p6 = scmp.lt.s32.totalorder %s96_s20, %s96_s20 }
  0x34   :  { %p543_p5 = scmp.ne.s32.totalorder %s96_s20, %s542_s3  ;;  %p548_p7 = scmp.lt.s32.totalorder %s542_s3, %s542_s3 }
  0x36   :  { %p549_p8 = por %p548_p7, %p547_p6 }
  0x38   :  { %p550_p9 = pnand %p549_p8, %p543_p5 }
  0x3a   :  { %553 = shalt.err (!%p550_p9)
}
  0x3b   :  { %101 = dma.hbm_to_vmem [thread:$0]  %s1328_s5, 512, %s96_s20, [#allocation12], %s838_s18, %s838_s18, %s839_s19  }
  0x3c   :  { %s554_s21 = scalar_lea.hbm %s1330_s7, 256 }
  0x3d   :  { %p555_p10 = scmp.ne.s32.totalorder %s1330_s7, %s554_s21  ;;  %p558_p11 = scmp.lt.u32.totalorder %s554_s21, %s1330_s7 }
  0x3f   :  { %p560_p12 = pnand %p558_p11, %p555_p10 }
  0x41   :  { %563 = shalt.err (!%p560_p12)
}
  0x42   :  { %s564_s29 = scalar_lea.vmem %s975_s23, 256  ;;  %p569_p0 = scmp.lt.s32.totalorder %s975_s23, %s975_s23 }
  0x43   :  { %p565_p13 = scmp.ne.s32.totalorder %s975_s23, %s564_s29  ;;  %p570_p1 = scmp.lt.s32.totalorder %s564_s29, %s564_s29 }
  0x45   :  { %p571_p2 = por %p570_p1, %p569_p0 }
  0x47   :  { %p572_p3 = pnand %p571_p2, %p565_p13 }
  0x49   :  { %575 = shalt.err (!%p572_p3)
}
  0x4a   :  { %125 = dma.hbm_to_vmem [thread:$0]  %s1330_s7, 256, %s975_s23, [#allocation15], %s838_s18, %s838_s18, %s839_s19  }
  0x4b   :  { %s842_s30 = smov [#allocation17]   ;;  %s843_s3 = smov [#allocation20]  }
  0x4c   :  { %s143_s0 = sshll.u32 %s842_s30, 4  ;;  %s167_s24 = sshll.u32 %s843_s3, 4  ;;  %s144_s0 = int_to_ptr.vmem [resolvable:$true] %s143_s0  ;;  %s1012_s24 = int_to_ptr.vmem [resolvable:$true] %s167_s24 }
  0x4d   :  { %s576_s17 = scalar_lea.hbm %s1332_s9, 256 }
  0x4e   :  { %p577_p4 = scmp.ne.s32.totalorder %s1332_s9, %s576_s17  ;;  %p580_p5 = scmp.lt.u32.totalorder %s576_s17, %s1332_s9 }
  0x50   :  { %p582_p6 = pnand %p580_p5, %p577_p4 }
  0x52   :  { %585 = shalt.err (!%p582_p6)
}
  0x53   :  { %s586_s7 = scalar_lea.vmem %s144_s0, 256  ;;  %p591_p8 = scmp.lt.s32.totalorder %s144_s0, %s144_s0 }
  0x54   :  { %p587_p7 = scmp.ne.s32.totalorder %s144_s0, %s586_s7  ;;  %p592_p9 = scmp.lt.s32.totalorder %s586_s7, %s586_s7 }
  0x56   :  { %p593_p10 = por %p592_p9, %p591_p8 }
  0x58   :  { %p594_p11 = pnand %p593_p10, %p587_p7 }
  0x5a   :  { %597 = shalt.err (!%p594_p11)
}
  0x5b   :  { %149 = dma.hbm_to_vmem [thread:$0]  %s1332_s9, 256, %s144_s0, [#allocation18], %s838_s18, %s838_s18, %s839_s19  }
  0x5c   :  { %s598_s20 = scalar_lea.hbm %s1334_s11, 256 }
  0x5d   :  { %p599_p12 = scmp.ne.s32.totalorder %s1334_s11, %s598_s20  ;;  %p602_p13 = scmp.lt.u32.totalorder %s598_s20, %s1334_s11 }
  0x5f   :  { %p604_p0 = pnand %p602_p13, %p599_p12 }
  0x61   :  { %607 = shalt.err (!%p604_p0)
}
  0x62   :  { %s608_s17 = scalar_lea.vmem %s1012_s24, 256  ;;  %p613_p2 = scmp.lt.s32.totalorder %s1012_s24, %s1012_s24 }
  0x63   :  { %p609_p1 = scmp.ne.s32.totalorder %s1012_s24, %s608_s17  ;;  %p614_p3 = scmp.lt.s32.totalorder %s608_s17, %s608_s17 }
  0x65   :  { %p615_p4 = por %p614_p3, %p613_p2 }
  0x67   :  { %p616_p5 = pnand %p615_p4, %p609_p1 }
  0x69   :  { %619 = shalt.err (!%p616_p5)
}
  0x6a   :  { %173 = dma.hbm_to_vmem [thread:$0]  %s1334_s11, 256, %s1012_s24, [#allocation21], %s838_s18, %s838_s18, %s839_s19  }
  0x6b   :  { %s844_s21 = smov [#allocation2]   ;;  %s845_s26 = smov [#allocation7]  }
  0x6c   :  { %s35_s25 = sshll.u32 %s844_s21, 4  ;;  %s59_s27 = sshll.u32 %s845_s26, 4  ;;  %s36_s25 = int_to_ptr.vmem [resolvable:$true] %s35_s25  ;;  %s1049_s27 = int_to_ptr.vmem [resolvable:$true] %s59_s27 }
  0x6d   :  { %s1342_s28 = sld [smem:[#allocation35_spill]] }
  0x73   :  { %s620_s29 = scalar_lea.hbm %s1342_s28, 512 }
  0x74   :  { %p621_p6 = scmp.ne.s32.totalorder %s1342_s28, %s620_s29  ;;  %p624_p7 = scmp.lt.u32.totalorder %s620_s29, %s1342_s28 }
  0x76   :  { %p626_p8 = pnand %p624_p7, %p621_p6 }
  0x78   :  { %629 = shalt.err (!%p626_p8)
}
  0x79   :  { %s630_s11 = scalar_lea.vmem %s36_s25, 512  ;;  %p635_p10 = scmp.lt.s32.totalorder %s36_s25, %s36_s25 }
  0x7a   :  { %p631_p9 = scmp.ne.s32.totalorder %s36_s25, %s630_s11  ;;  %p636_p11 = scmp.lt.s32.totalorder %s630_s11, %s630_s11 }
  0x7c   :  { %p637_p12 = por %p636_p11, %p635_p10 }
  0x7e   :  { %p638_p13 = pnand %p637_p12, %p631_p9 }
  0x80   :  { %641 = shalt.err (!%p638_p13)
}
  0x81   :  { %41 = dma.hbm_to_vmem [thread:$0]  %s1342_s28, 512, %s36_s25, [#allocation3], %s838_s18, %s838_s18, %s839_s19  }
  0x82   :  { %s642_s9 = scalar_lea.hbm %s1325_s2, 512 }
  0x83   :  { %p643_p0 = scmp.ne.s32.totalorder %s1325_s2, %s642_s9  ;;  %p646_p1 = scmp.lt.u32.totalorder %s642_s9, %s1325_s2 }
  0x85   :  { %p648_p2 = pnand %p646_p1, %p643_p0 }
  0x87   :  { %651 = shalt.err (!%p648_p2)
}
  0x88   :  { %s652_s23 = scalar_lea.vmem %s1049_s27, 512  ;;  %p657_p4 = scmp.lt.s32.totalorder %s1049_s27, %s1049_s27 }
  0x89   :  { %p653_p3 = scmp.ne.s32.totalorder %s1049_s27, %s652_s23  ;;  %p658_p5 = scmp.lt.s32.totalorder %s652_s23, %s652_s23 }
  0x8b   :  { %p659_p6 = por %p658_p5, %p657_p4 }
  0x8d   :  { %p660_p7 = pnand %p659_p6, %p653_p3 }
  0x8f   :  { %663 = shalt.err (!%p660_p7)
}
  0x90   :  { %65 = dma.hbm_to_vmem [thread:$0]  %s1325_s2, 512, %s1049_s27, [#allocation6], %s838_s18, %s838_s18, %s839_s19  }
  0x91   :  { %s846_s29 = smov [#allocation10]   ;;  %s847_s20 = smov [#allocation13]  }
  0x92   :  { %s83_s5 = sshll.u32 %s846_s29, 4  ;;  %s107_s30 = sshll.u32 %s847_s20, 4  ;;  %s84_s5 = int_to_ptr.vmem [resolvable:$true] %s83_s5  ;;  %s1086_s30 = int_to_ptr.vmem [resolvable:$true] %s107_s30 }
  0x93   :  { %s664_s24 = scalar_lea.hbm %s1327_s4, 512 }
  0x94   :  { %p665_p8 = scmp.ne.s32.totalorder %s1327_s4, %s664_s24  ;;  %p668_p9 = scmp.lt.u32.totalorder %s664_s24, %s1327_s4 }
  0x96   :  { %p670_p10 = pnand %p668_p9, %p665_p8 }
  0x98   :  { %673 = shalt.err (!%p670_p10)
}
  0x99   :  { %s674_s2 = scalar_lea.vmem %s84_s5, 512  ;;  %p679_p12 = scmp.lt.s32.totalorder %s84_s5, %s84_s5 }
  0x9a   :  { %p675_p11 = scmp.ne.s32.totalorder %s84_s5, %s674_s2  ;;  %p680_p13 = scmp.lt.s32.totalorder %s674_s2, %s674_s2 }
  0x9c   :  { %p681_p0 = por %p680_p13, %p679_p12 }
  0x9e   :  { %p682_p1 = pnand %p681_p0, %p675_p11 }
  0xa0   :  { %685 = shalt.err (!%p682_p1)
}
  0xa1   :  { %89 = dma.hbm_to_vmem [thread:$0]  %s1327_s4, 512, %s84_s5, [#allocation9], %s838_s18, %s838_s18, %s839_s19  }
  0xa2   :  { %s686_s7 = scalar_lea.hbm %s1329_s6, 256 }
  0xa3   :  { %p687_p2 = scmp.ne.s32.totalorder %s1329_s6, %s686_s7  ;;  %p690_p3 = scmp.lt.u32.totalorder %s686_s7, %s1329_s6 }
  0xa5   :  { %p692_p4 = pnand %p690_p3, %p687_p2 }
  0xa7   :  { %695 = shalt.err (!%p692_p4)
}
  0xa8   :  { %s696_s20 = scalar_lea.vmem %s1086_s30, 256  ;;  %p701_p6 = scmp.lt.s32.totalorder %s1086_s30, %s1086_s30 }
  0xa9   :  { %p697_p5 = scmp.ne.s32.totalorder %s1086_s30, %s696_s20  ;;  %p702_p7 = scmp.lt.s32.totalorder %s696_s20, %s696_s20 }
  0xab   :  { %p703_p8 = por %p702_p7, %p701_p6 }
  0xad   :  { %p704_p9 = pnand %p703_p8, %p697_p5 }
  0xaf   :  { %707 = shalt.err (!%p704_p9)
}
  0xb0   :  { %113 = dma.hbm_to_vmem [thread:$0]  %s1329_s6, 256, %s1086_s30, [#allocation12], %s838_s18, %s838_s18, %s839_s19  }
  0xb1   :  { %s848_s3 = smov [#allocation16]   ;;  %s849_s24 = smov [#allocation19]  }
  0xb2   :  { %s131_s11 = sshll.u32 %s848_s3, 4  ;;  %s155_s1 = sshll.u32 %s849_s24, 4  ;;  %s132_s11 = int_to_ptr.vmem [resolvable:$true] %s131_s11  ;;  %s1123_s1 = int_to_ptr.vmem [resolvable:$true] %s155_s1 }
  0xb3   :  { %s708_s9 = scalar_lea.hbm %s1331_s8, 256 }
  0xb4   :  { %p709_p10 = scmp.ne.s32.totalorder %s1331_s8, %s708_s9  ;;  %p712_p11 = scmp.lt.u32.totalorder %s708_s9, %s1331_s8 }
  0xb6   :  { %p714_p12 = pnand %p712_p11, %p709_p10 }
  0xb8   :  { %717 = shalt.err (!%p714_p12)
}
  0xb9   :  { %s718_s6 = scalar_lea.vmem %s132_s11, 256  ;;  %p723_p0 = scmp.lt.s32.totalorder %s132_s11, %s132_s11 }
  0xba   :  { %p719_p13 = scmp.ne.s32.totalorder %s132_s11, %s718_s6  ;;  %p724_p1 = scmp.lt.s32.totalorder %s718_s6, %s718_s6 }
  0xbc   :  { %p725_p2 = por %p724_p1, %p723_p0 }
  0xbe   :  { %p726_p3 = pnand %p725_p2, %p719_p13 }
  0xc0   :  { %729 = shalt.err (!%p726_p3)
}
  0xc1   :  { %137 = dma.hbm_to_vmem [thread:$0]  %s1331_s8, 256, %s132_s11, [#allocation15], %s838_s18, %s838_s18, %s839_s19  }
  0xc2   :  { %s730_s25 = scalar_lea.hbm %s1333_s10, 256 }
  0xc3   :  { %p731_p4 = scmp.ne.s32.totalorder %s1333_s10, %s730_s25  ;;  %p734_p5 = scmp.lt.u32.totalorder %s730_s25, %s1333_s10 }
  0xc5   :  { %p736_p6 = pnand %p734_p5, %p731_p4 }
  0xc7   :  { %739 = shalt.err (!%p736_p6)
}
  0xc8   :  { %s740_s5 = scalar_lea.vmem %s1123_s1, 256  ;;  %p745_p8 = scmp.lt.s32.totalorder %s1123_s1, %s1123_s1 }
  0xc9   :  { %p741_p7 = scmp.ne.s32.totalorder %s1123_s1, %s740_s5  ;;  %p746_p9 = scmp.lt.s32.totalorder %s740_s5, %s740_s5 }
  0xcb   :  { %p747_p10 = por %p746_p9, %p745_p8 }
  0xcd   :  { %p748_p11 = pnand %p747_p10, %p741_p7 }
  0xcf   :  { %751 = shalt.err (!%p748_p11)
}
  0xd0   :  { %161 = dma.hbm_to_vmem [thread:$0]  %s1333_s10, 256, %s1123_s1, [#allocation18], %s838_s18, %s838_s18, %s839_s19  }
  0xd1   :  { %s850_s11 = smov [#allocation22]   ;;  %s851_s22 = smov [#allocation23]  }
  0xd2   :  { %s183_s24 = sshll.u32 %s850_s11, 4  ;;  %s195_s17 = sshll.u32 %s851_s22, 4  ;;  %s184_s24 = int_to_ptr.vmem [resolvable:$true] %s183_s24  ;;  %s1160_s17 = int_to_ptr.vmem [resolvable:$true] %s195_s17 }
  0xd3   :  { %s752_s27 = scalar_lea.hbm %s1337_s14, 512 }
  0xd4   :  { %p753_p12 = scmp.ne.s32.totalorder %s1337_s14, %s752_s27  ;;  %p756_p13 = scmp.lt.u32.totalorder %s752_s27, %s1337_s14 }
  0xd6   :  { %p758_p0 = pnand %p756_p13, %p753_p12 }
  0xd8   :  { %761 = shalt.err (!%p758_p0)
}
  0xd9   :  { %s762_s10 = scalar_lea.vmem %s184_s24, 512  ;;  %p767_p2 = scmp.lt.s32.totalorder %s184_s24, %s184_s24 }
  0xda   :  { %p763_p1 = scmp.ne.s32.totalorder %s184_s24, %s762_s10  ;;  %p768_p3 = scmp.lt.s32.totalorder %s762_s10, %s762_s10 }
  0xdc   :  { %p769_p4 = por %p768_p3, %p767_p2 }
  0xde   :  { %p770_p5 = pnand %p769_p4, %p763_p1 }
  0xe0   :  { %773 = shalt.err (!%p770_p5)
}
  0xe1   :  { %189 = dma.hbm_to_vmem [thread:$0]  %s1337_s14, 512, %s184_s24, [#allocation21], %s838_s18, %s838_s18, %s839_s19  }
  0xe2   :  { %s774_s25 = scalar_lea.hbm %s1338_s15, 256 }
  0xe3   :  { %p775_p6 = scmp.ne.s32.totalorder %s1338_s15, %s774_s25  ;;  %p778_p7 = scmp.lt.u32.totalorder %s774_s25, %s1338_s15 }
  0xe5   :  { %p780_p8 = pnand %p778_p7, %p775_p6 }
  0xe7   :  { %783 = shalt.err (!%p780_p8)
}
  0xe8   :  { %s784_s5 = scalar_lea.vmem %s1160_s17, 256  ;;  %p789_p10 = scmp.lt.s32.totalorder %s1160_s17, %s1160_s17 }
  0xe9   :  { %p785_p9 = scmp.ne.s32.totalorder %s1160_s17, %s784_s5  ;;  %p790_p11 = scmp.lt.s32.totalorder %s784_s5, %s784_s5 }
  0xeb   :  { %p791_p12 = por %p790_p11, %p789_p10 }
  0xed   :  { %p792_p13 = pnand %p791_p12, %p785_p9 }
  0xef   :  { %795 = shalt.err (!%p792_p13)
}
  0xf0   :  { %201 = dma.hbm_to_vmem [thread:$0]  %s1338_s15, 256, %s1160_s17, [#allocation24], %s838_s18, %s838_s18, %s839_s19  }
  0xf1   :  { %818 = dma.done.wait [#allocation3], 512  }
  0xf2   :  { %819 = vsyncadd [#allocation3], 4294966784 }
  0xf3   :  { %820 = dma.done.wait [#allocation6], 1024  }
  0xf4   :  { %821 = vsyncadd [#allocation6], 4294966272 }
  0xf5   :  { %822 = dma.done.wait [#allocation9], 1024  }
  0xf6   :  { %823 = vsyncadd [#allocation9], 4294966272 }
  0xf7   :  { %824 = dma.done.wait [#allocation12], 768  }
  0xf8   :  { %825 = vsyncadd [#allocation12], 4294966528 }
  0xf9   :  { %826 = dma.done.wait [#allocation15], 512  }
  0xfa   :  { %827 = vsyncadd [#allocation15], 4294966784 }
  0xfb   :  { %828 = dma.done.wait [#allocation18], 512  }
  0xfc   :  { %829 = vsyncadd [#allocation18], 4294966784 }
  0xfd   :  { %830 = dma.done.wait [#allocation21], 768  }
  0xfe   :  { %831 = vsyncadd [#allocation21], 4294966528 }
  0xff   :  { %832 = dma.done.wait [#allocation24], 256  }
 0x100   :  { %833 = vsyncadd [#allocation24], 4294967040  ;;  %v1200_v0 = vld [vmem:[%s1335_s12] sm:$0xff]  ;;  %v1205_v1 = vld [vmem:[%s1335_s12 + $0x8] sm:$0xff] }
 0x101   :  { %v1210_v2 = vld [vmem:[%s1335_s12 + $0x10] sm:$0xff]  ;;  %v1215_v3 = vld [vmem:[%s1335_s12 + $0x18] sm:$0xff]  ;;  %v1220_v4 = vld [vmem:[%s1336_s13] sm:$0xff]  ;;  %s852_s12 = smov [#allocation25]  }
 0x102   :  { %v1225_v5 = vld [vmem:[%s1336_s13 + $0x8] sm:$0xff]  ;;  %v1227_v6 = vld [vmem:[#allocation22] sm:$0xff]  ;;  %v1231_v8 = vld [vmem:[#allocation22 + $0x10] sm:$0xff]  ;;  %s455_s13 = sshll.u32 %s852_s12, 4  ;;  %s456_s13 = int_to_ptr.vmem [resolvable:$true] %s455_s13 }
 0x103   :  { %v1229_v7 = vld [vmem:[#allocation22 + $0x8] sm:$0xff]  ;;  %v1233_v9 = vld [vmem:[#allocation22 + $0x18] sm:$0xff]  ;;  %v1235_v10 = vld [vmem:[#allocation23] sm:$0xff]  ;;  %s796_s21 = scalar_lea.vmem %s456_s13, 128  ;;  %p801_p1 = scmp.lt.s32.totalorder %s456_s13, %s456_s13 }
 0x104   :  { %v1237_v11 = vld [vmem:[#allocation23 + $0x8] sm:$0xff]  ;;  %v256_v12 = vld [vmem:[#allocation2] sm:$0xff]  ;;  %v258_v14 = vld [vmem:[#allocation2 + $0x10] sm:$0xff]  ;;  %p797_p0 = scmp.ne.s32.totalorder %s456_s13, %s796_s21  ;;  %p802_p2 = scmp.lt.s32.totalorder %s796_s21, %s796_s21 }
 0x105   :  { %v257_v13 = vld [vmem:[#allocation2 + $0x8] sm:$0xff]  ;;  %v259_v15 = vld [vmem:[#allocation2 + $0x18] sm:$0xff]  ;;  %v260_v16 = vsub.f32 %v256_v12, %v1200_v0  ;;  %v262_v18 = vsub.f32 %v258_v14, %v1210_v2  ;;  %v277_v19 = vld [vmem:[#allocation13] sm:$0xff] }
 0x106   :  { %v261_v17 = vsub.f32 %v257_v13, %v1205_v1  ;;  %v278_v20 = vld [vmem:[#allocation13 + $0x8] sm:$0xff]  ;;  %v263_v21 = vsub.f32 %v259_v15, %v1215_v3  ;;  %v279_v22 = vsub.f32 %v277_v19, %v1220_v4  ;;  %v288_v24 = vld [vmem:[#allocation5] sm:$0xff]  ;;  %v290_v26 = vld [vmem:[#allocation5 + $0x10] sm:$0xff]  ;;  %p803_p3 = por %p802_p2, %p801_p1 }
 0x107   :  { %v280_v23 = vsub.f32 %v278_v20, %v1225_v5  ;;  %v289_v25 = vld [vmem:[#allocation5 + $0x8] sm:$0xff]  ;;  %v264_v27 = vmul.f32 %v260_v16, %v1227_v6  ;;  %v266_v29 = vmul.f32 %v262_v18, %v1231_v8  ;;  %v291_v30 = vld [vmem:[#allocation5 + $0x18] sm:$0xff]  ;;  %v292_v31 = vsub.f32 %v288_v24, %v1200_v0  ;;  %v309_v40 = vld [vmem:[#allocation14] sm:$0xff] }
 0x108   :  { %v265_v28 = vmul.f32 %v261_v17, %v1229_v7  ;;  %v267_v32 = vmul.f32 %v263_v21, %v1233_v9  ;;  %v281_v33 = vmul.f32 %v279_v22, %v1235_v10  ;;  %v293_v35 = vsub.f32 %v289_v25, %v1205_v1  ;;  %v310_v41 = vld [vmem:[#allocation14 + $0x8] sm:$0xff]  ;;  %v320_v54 = vld [vmem:[#allocation7] sm:$0xff]  ;;  %v321_v55 = vld [vmem:[#allocation7 + $0x8] sm:$0xff]  ;;  %p804_p4 = pnand %p803_p3, %p797_p0 }
 0x109   :  { %v282_v34 = vmul.f32 %v280_v23, %v1237_v11  ;;  %v268_v36 = vmul.f32 %v264_v27, %v264_v27  ;;  %v270_v38 = vmul.f32 %v266_v29, %v266_v29  ;;  %v294_v39 = vsub.f32 %v290_v26, %v1210_v2  ;;  %v322_v60 = vld [vmem:[#allocation7 + $0x10] sm:$0xff]  ;;  %v323_v61 = vld [vmem:[#allocation7 + $0x18] sm:$0xff]  ;;  %v341_v18 = vld [vmem:[#allocation16] sm:$0xff] }
 0x10a   :  { %v269_v37 = vmul.f32 %v265_v28, %v265_v28  ;;  %v271_v42 = vmul.f32 %v267_v32, %v267_v32  ;;  %v283_v43 = vmul.f32 %v281_v33, %v281_v33  ;;  %v295_v45 = vsub.f32 %v291_v30, %v1215_v3  ;;  %v342_v27 = vld [vmem:[#allocation16 + $0x8] sm:$0xff]  ;;  %v352_v32 = vld [vmem:[#allocation8] sm:$0xff] }
 0x10b   :  { %v284_v44 = vmul.f32 %v282_v34, %v282_v34  ;;  %v296_v47 = vmul.f32 %v292_v31, %v1227_v6  ;;  %v297_v48 = vmul.f32 %v293_v35, %v1229_v7  ;;  %v298_v49 = vmul.f32 %v294_v39, %v1231_v8  ;;  %v355_v39 = vld [vmem:[#allocation8 + $0x18] sm:$0xff] }
 0x10c   :  { %v272_v46 = vadd.f32 %v269_v37, %v268_v36  ;;  %v299_v51 = vmul.f32 %v295_v45, %v1233_v9  ;;  %v311_v52 = vsub.f32 %v309_v40, %v1220_v4  ;;  %v312_v53 = vsub.f32 %v310_v41, %v1225_v5  ;;  %v353_v37 = vld [vmem:[#allocation8 + $0x8] sm:$0xff] }
 0x10d   :  { %v285_v50 = vadd.f32 %v284_v44, %v283_v43  ;;  %v300_v57 = vmul.f32 %v296_v47, %v296_v47  ;;  %v301_v58 = vmul.f32 %v297_v48, %v297_v48  ;;  %v302_v59 = vmul.f32 %v298_v49, %v298_v49 }
 0x10e   :  { %v273_v56 = vadd.f32 %v272_v46, %v270_v38  ;;  %v303_v63 = vmul.f32 %v299_v51, %v299_v51  ;;  %v313_v12 = vmul.f32 %v311_v52, %v1235_v10  ;;  %v314_v13 = vmul.f32 %v312_v53, %v1237_v11  ;;  %v354_v38 = vld [vmem:[#allocation8 + $0x10] sm:$0xff] }
 0x10f   :  { %v286_v62 = vmul.f32 0.00048828125, %v285_v50  ;;  %v304_v15 = vadd.f32 %v301_v58, %v300_v57  ;;  %v324_v16 = vsub.f32 %v320_v54, %v1200_v0  ;;  %v325_v17 = vsub.f32 %v321_v55, %v1205_v1  ;;  %v373_v52 = vld [vmem:[#allocation17] sm:$0xff] }
 0x110   :  { %v274_v14 = vadd.f32 %v273_v56, %v271_v42  ;;  %v315_v19 = vmul.f32 %v313_v12, %v313_v12  ;;  %v316_v20 = vmul.f32 %v314_v13, %v314_v13  ;;  %v326_v21 = vsub.f32 %v322_v60, %v1210_v2 }
 0x111   :  { %v327_v22 = vsub.f32 %v323_v61, %v1215_v3  ;;  %v305_v24 = vadd.f32 %v304_v15, %v302_v59  ;;  %v328_v25 = vmul.f32 %v324_v16, %v1227_v6  ;;  %v329_v26 = vmul.f32 %v325_v17, %v1229_v7  ;;  %v374_v61 = vld [vmem:[#allocation17 + $0x8] sm:$0xff]  ;;  %v385_v15 = vld [vmem:[#allocation10 + $0x8] sm:$0xff]  ;;  %v386_v16 = vld [vmem:[#allocation10 + $0x10] sm:$0xff] }
 0x112   :  { %v275_v23 = vmul.f32 0.00024414063, %v274_v14  ;;  %v317_v28 = vadd.f32 %v316_v20, %v315_v19  ;;  %v330_v29 = vmul.f32 %v326_v21, %v1231_v8  ;;  %v343_v31 = vsub.f32 %v341_v18, %v1220_v4  ;;  %v387_v21 = vld [vmem:[#allocation10 + $0x18] sm:$0xff] }
 0x113   :  { %v331_v30 = vmul.f32 %v327_v22, %v1233_v9  ;;  %v306_v34 = vadd.f32 %v305_v24, %v303_v63  ;;  %v332_v35 = vmul.f32 %v328_v25, %v328_v25  ;;  %v333_v36 = vmul.f32 %v329_v26, %v329_v26 }
 0x114   :  { %v287_v33 = vadd.f32 %v286_v62, %v275_v23  ;;  %v318_v40 = vmul.f32 0.00048828125, %v317_v28  ;;  %v334_v41 = vmul.f32 %v330_v29, %v330_v29  ;;  %v344_v43 = vsub.f32 %v342_v27, %v1225_v5  ;;  %v384_v62 = vld [vmem:[#allocation10] sm:$0xff] }
 0x115   :  { %v335_v42 = vmul.f32 %v331_v30, %v331_v30  ;;  %v307_v44 = vmul.f32 0.00024414063, %v306_v34  ;;  %v336_v45 = vadd.f32 %v333_v36, %v332_v35  ;;  %v345_v46 = vmul.f32 %v343_v31, %v1235_v10  ;;  %v405_v30 = vld [vmem:[#allocation19] sm:$0xff] }
 0x116   :  { %v356_v47 = vsub.f32 %v352_v32, %v1200_v0  ;;  %v346_v48 = vmul.f32 %v344_v43, %v1237_v11  ;;  %v357_v49 = vsub.f32 %v353_v37, %v1205_v1  ;;  %v358_v50 = vsub.f32 %v354_v38, %v1210_v2 }
 0x117   :  { %v359_v51 = vsub.f32 %v355_v39, %v1215_v3  ;;  %v308_v53 = vadd.f32 %v307_v44, %v287_v33  ;;  %v337_v54 = vadd.f32 %v336_v45, %v334_v41  ;;  %v347_v55 = vmul.f32 %v345_v46, %v345_v46  ;;  %v406_v39 = vld [vmem:[#allocation19 + $0x8] sm:$0xff]  ;;  %v416_v44 = vld [vmem:[#allocation11] sm:$0xff] }
 0x118   :  { %v360_v56 = vmul.f32 %v356_v47, %v1227_v6  ;;  %v348_v57 = vmul.f32 %v346_v48, %v346_v48  ;;  %v361_v58 = vmul.f32 %v357_v49, %v1229_v7  ;;  %v362_v59 = vmul.f32 %v358_v50, %v1231_v8  ;;  %v417_v45 = vld [vmem:[#allocation11 + $0x8] sm:$0xff]  ;;  %v418_v50 = vld [vmem:[#allocation11 + $0x10] sm:$0xff] }
 0x119   :  { %v363_v60 = vmul.f32 %v359_v51, %v1233_v9  ;;  %v319_v63 = vadd.f32 %v318_v40, %v308_v53  ;;  %v338_v12 = vadd.f32 %v337_v54, %v335_v42  ;;  %v375_v14 = vsub.f32 %v373_v52, %v1220_v4 }
 0x11a   :  { %v364_v13 = vmul.f32 %v360_v56, %v360_v56  ;;  %v349_v17 = vadd.f32 %v348_v57, %v347_v55  ;;  %v365_v18 = vmul.f32 %v361_v58, %v361_v58  ;;  %v366_v19 = vmul.f32 %v362_v59, %v362_v59  ;;  %v419_v55 = vld [vmem:[#allocation11 + $0x18] sm:$0xff] }
 0x11b   :  { %v367_v20 = vmul.f32 %v363_v60, %v363_v60  ;;  %v339_v22 = vmul.f32 0.00024414063, %v338_v12  ;;  %v376_v23 = vsub.f32 %v374_v61, %v1225_v5  ;;  %v377_v24 = vmul.f32 %v375_v14, %v1235_v10  ;;  %v437_v60 = vld [vmem:[#allocation20] sm:$0xff] }
 0x11c   :  { %v388_v25 = vsub.f32 %v384_v62, %v1200_v0  ;;  %v350_v26 = vmul.f32 0.00048828125, %v349_v17  ;;  %v368_v27 = vadd.f32 %v365_v18, %v364_v13  ;;  %v389_v28 = vsub.f32 %v385_v15, %v1205_v1  ;;  %v438_v17 = vld [vmem:[#allocation20 + $0x8] sm:$0xff] }
 0x11d   :  { %v390_v29 = vsub.f32 %v386_v16, %v1210_v2  ;;  %v340_v31 = vadd.f32 %v339_v22, %v319_v63  ;;  %v378_v32 = vmul.f32 %v376_v23, %v1237_v11  ;;  %v379_v33 = vmul.f32 %v377_v24, %v377_v24 }
 0x11e   :  { %v391_v34 = vsub.f32 %v387_v21, %v1215_v3  ;;  %v369_v35 = vadd.f32 %v368_v27, %v366_v19  ;;  %v392_v36 = vmul.f32 %v388_v25, %v1227_v6  ;;  %v393_v37 = vmul.f32 %v389_v28, %v1229_v7 }
 0x11f   :  { %v394_v38 = vmul.f32 %v390_v29, %v1231_v8  ;;  %v351_v40 = vadd.f32 %v350_v26, %v340_v31  ;;  %v380_v41 = vmul.f32 %v378_v32, %v378_v32  ;;  %v407_v43 = vsub.f32 %v405_v30, %v1220_v4 }
 0x120   :  { %v395_v42 = vmul.f32 %v391_v34, %v1233_v9  ;;  %v370_v46 = vadd.f32 %v369_v35, %v367_v20  ;;  %v396_v47 = vmul.f32 %v392_v36, %v392_v36  ;;  %v397_v48 = vmul.f32 %v393_v37, %v393_v37 }
 0x121   :  { %v398_v49 = vmul.f32 %v394_v38, %v394_v38  ;;  %v381_v51 = vadd.f32 %v380_v41, %v379_v33  ;;  %v408_v53 = vsub.f32 %v406_v39, %v1225_v5  ;;  %v409_v54 = vmul.f32 %v407_v43, %v1235_v10 }
 0x122   :  { %v399_v52 = vmul.f32 %v395_v42, %v395_v42  ;;  %v371_v56 = vmul.f32 0.00024414063, %v370_v46  ;;  %v400_v57 = vadd.f32 %v397_v48, %v396_v47  ;;  %v420_v58 = vsub.f32 %v416_v44, %v1200_v0 }
 0x123   :  { %v421_v59 = vsub.f32 %v417_v45, %v1205_v1  ;;  %v382_v61 = vmul.f32 0.00048828125, %v381_v51  ;;  %v410_v62 = vmul.f32 %v408_v53, %v1237_v11  ;;  %v411_v63 = vmul.f32 %v409_v54, %v409_v54 }
 0x124   :  { %v422_v12 = vsub.f32 %v418_v50, %v1210_v2  ;;  %v372_v13 = vadd.f32 %v371_v56, %v351_v40  ;;  %v401_v14 = vadd.f32 %v400_v57, %v398_v49  ;;  %v423_v15 = vsub.f32 %v419_v55, %v1215_v3 }
 0x125   :  { %v424_v16 = vmul.f32 %v420_v58, %v1227_v6  ;;  %v412_v18 = vmul.f32 %v410_v62, %v410_v62  ;;  %v425_v19 = vmul.f32 %v421_v59, %v1229_v7  ;;  %v439_v1 = vsub.f32 %v437_v60, %v1220_v4 }
 0x126   :  { %v426_v0 = vmul.f32 %v422_v12, %v1231_v8  ;;  %v383_v20 = vadd.f32 %v382_v61, %v372_v13  ;;  %v402_v21 = vadd.f32 %v401_v14, %v399_v52  ;;  %v427_v22 = vmul.f32 %v423_v15, %v1233_v9 }
 0x127   :  { %v428_v23 = vmul.f32 %v424_v16, %v424_v16  ;;  %v413_v2 = vadd.f32 %v412_v18, %v411_v63  ;;  %v429_v24 = vmul.f32 %v425_v19, %v425_v19  ;;  %v440_v3 = vsub.f32 %v438_v17, %v1225_v5 }
 0x128   :  { %v430_v25 = vmul.f32 %v426_v0, %v426_v0  ;;  %v403_v26 = vmul.f32 0.00024414063, %v402_v21  ;;  %v441_v6 = vmul.f32 %v439_v1, %v1235_v10  ;;  %v431_v28 = vmul.f32 %v427_v22, %v427_v22 }
 0x129   :  { %v414_v27 = vmul.f32 0.00048828125, %v413_v2  ;;  %v432_v7 = vadd.f32 %v429_v24, %v428_v23  ;;  %v442_v8 = vmul.f32 %v440_v3, %v1237_v11 }
 0x12a   :  { %v404_v29 = vadd.f32 %v403_v26, %v383_v20  ;;  %v443_v4 = vmul.f32 %v441_v6, %v441_v6 }
 0x12b   :  { %v433_v30 = vadd.f32 %v432_v7, %v430_v25  ;;  %v444_v31 = vmul.f32 %v442_v8, %v442_v8 }
 0x12c   :  { %v415_v32 = vadd.f32 %v414_v27, %v404_v29 }
 0x12d   :  { %v434_v9 = vadd.f32 %v433_v30, %v431_v28  ;;  %v445_v33 = vadd.f32 %v444_v31, %v443_v4 }
 0x12f   :  { %v435_v34 = vmul.f32 0.00024414063, %v434_v9  ;;  %v446_v35 = vmul.f32 0.00048828125, %v445_v33 }
 0x131   :  { %v436_v5 = vadd.f32 %v435_v34, %v415_v32 }
 0x133   :  { %v447_v36 = vadd.f32 %v446_v35, %v436_v5 }
 0x135   :  { %448 = vst [vmem:[#allocation25] sm:$0xff] %v447_v36 }
 0x136   :  { %807 = shalt.err (!%p804_p4)
}
 0x137   :  { %s808_s10 = scalar_lea.hbm %s1339_s16, 128 }
 0x138   :  { %p809_p5 = scmp.ne.s32.totalorder %s1339_s16, %s808_s10  ;;  %p812_p6 = scmp.lt.u32.totalorder %s808_s10, %s1339_s16 }
 0x13a   :  { %p814_p7 = pnand %p812_p6, %p809_p5 }
 0x13c   :  { %817 = shalt.err (!%p814_p7)
}
 0x13d   :  { %458 = dma.vmem_to_hbm [thread:$0]  %s456_s13, 128, %s1339_s16, [#allocation4]  }
 0x13e   :  { %834 = dma.done.wait [#allocation4], 128  }
 0x13f   :  { %835 = vsyncadd [#allocation4], 4294967168 }
 0x140   :  { %462 = vsyncpa [#allocation3], 1 }
 0x141   :  { %463 = vsyncpa [#allocation6], 1 }
 0x142   :  { %464 = vsyncpa [#allocation9], 1 }
 0x143   :  { %465 = vsyncpa [#allocation12], 1 }
 0x144   :  { %466 = vsyncpa [#allocation15], 1 }
 0x145   :  { %467 = vsyncpa [#allocation18], 1 }
 0x146   :  { %468 = vsyncpa [#allocation21], 1 }
 0x147   :  { %469 = vsyncpa [#allocation24], 1 }
 0x148   :  { %470 = vsyncpa [#allocation4], 1 }

</bundles_post_ra>
